<compile_context>
chip_gen: v7x
topology: tpu7x:2x2x1
jax: 0.10.0
libtpu: 0.0.40
codegen_flags: <defaults>
</compile_context>

<pallas_src>
import jax
import jax.numpy as jnp
from jax.experimental import pallas as pl
from jax.experimental.pallas import tpu as pltpu

OUT_DIM = 36   # fixed by the module definition
LANE = 128     # TPU lane width


def _round_up(n, m):
    return ((n + m - 1) // m) * m


def _round_down(n, m):
    return (n // m) * m


def _sublane_multiple(dtype):
    # f32 -> 8, bf16 -> 16, int8/fp8 -> 32 (sub-32-bit dtypes pack rows per sublane).
    return max(8, 32 // jnp.dtype(dtype).itemsize)


def _mlp_kernel(x_ref, w1_ref, b1_ref, w2_ref, b2_ref, o_ref):
    # x_ref: (TILE_B, in_dim), w1_ref: (in_dim, H_pad), b1_ref: (1, H_pad)
    # w2_ref: (H_pad, 36),     b2_ref: (1, 36),         o_ref: (TILE_B, 36)
    h = jnp.dot(x_ref[...], w1_ref[...], preferred_element_type=jnp.float32)
    h = jnp.maximum(h + b1_ref[...], 0.0)
    out = jnp.dot(h.astype(w2_ref.dtype), w2_ref[...],
                  preferred_element_type=jnp.float32)
    o_ref[...] = (out + b2_ref[...]).astype(o_ref.dtype)


def feedforward(x, w1, b1, w2, b2, *, tile_b=None,
                vmem_budget_bytes=12 * 1024 * 1024):
    """x: (B, input_dim); w1: (input_dim, hidden); b1: (hidden,);
    w2: (hidden, 36); b2: (36,). Returns (B, 36)."""
    B, in_dim = x.shape
    hidden = w1.shape[1]
    out_dim = w2.shape[1]

    itemsize = jnp.dtype(x.dtype).itemsize
    sub = _sublane_multiple(x.dtype)

    # ---- batch tile selection -------------------------------------------
    # Double-buffered x-tile + out-tile bytes per row.
    bytes_per_row = (in_dim + out_dim) * itemsize

    if B <= sub:
        # Tiny batch: single full-extent block (always a legal layout).
        tile_b_eff = B
    else:
        # Largest tile whose double-buffered activations fit the conservative
        # VMEM budget (safe on v5e 16 MiB / v6e 32 MiB / v7x 32 MiB scoped
        # defaults; weights are < 0.2 MiB and resident).
        auto = max(sub, _round_down(vmem_budget_bytes // (2 * bytes_per_row), sub))
        if tile_b is not None:
            auto = min(auto, max(sub, _round_up(tile_b, sub)))
        # Keep >= 2 grid steps so the "parallel" axis spans both v7x TCs.
        half = _round_up(pl.cdiv(B, 2), sub)
        tile_b_eff = max(sub, min(auto, half))

    grid = (pl.cdiv(B, tile_b_eff),)

    # ---- cheap one-time weight padding (hidden -> 128 lanes; exact math) --
    h_pad = _round_up(hidden, LANE)
    w1p = jnp.pad(w1, ((0, 0), (0, h_pad - hidden)))
    b1p = jnp.pad(b1.reshape(1, -1), ((0, 0), (0, h_pad - hidden)))
    w2p = jnp.pad(w2, ((0, h_pad - hidden), (0, 0)))
    b2p = b2.reshape(1, -1)

    w_itemsize = jnp.dtype(w1.dtype).itemsize
    weight_bytes = (w1p.size + b1p.size + w2p.size + b2p.size) * w_itemsize
    cost = pl.CostEstimate(
        flops=2 * B * (in_dim * h_pad + h_pad * out_dim),
        transcendentals=0,
        bytes_accessed=B * (in_dim + out_dim) * itemsize + weight_bytes,
    )

    return pl.pallas_call(
        _mlp_kernel,
        out_shape=jax.ShapeDtypeStruct((B, out_dim), x.dtype),
        grid=grid,
        in_specs=[
            pl.BlockSpec((tile_b_eff, in_dim), lambda i: (i, 0)),  # x: batch-tiled
            pl.BlockSpec((in_dim, h_pad), lambda i: (0, 0)),       # W1: resident
            pl.BlockSpec((1, h_pad), lambda i: (0, 0)),            # b1: resident
            pl.BlockSpec((h_pad, out_dim), lambda i: (0, 0)),      # W2: resident
            pl.BlockSpec((1, out_dim), lambda i: (0, 0)),          # b2: resident
        ],
        out_specs=pl.BlockSpec((tile_b_eff, out_dim), lambda i: (i, 0)),
        compiler_params=pltpu.CompilerParams(
            dimension_semantics=("parallel",)),
        cost_estimate=cost,
    )(x, w1p, b1p, w2p, b2p)


def init_params(key, input_dim, hidden_dim, dtype=jnp.float32):
    """Deterministic parameter init mirroring nn.Linear's uniform init."""
    k1, k2, k3, k4 = jax.random.split(key, 4)
    bound1 = 1.0 / jnp.sqrt(input_dim)
    bound2 = 1.0 / jnp.sqrt(hidden_dim)
    w1 = jax.random.uniform(k1, (input_dim, hidden_dim), dtype, -bound1, bound1)
    b1 = jax.random.uniform(k2, (hidden_dim,), dtype, -bound1, bound1)
    w2 = jax.random.uniform(k3, (hidden_dim, OUT_DIM), dtype, -bound2, bound2)
    b2 = jax.random.uniform(k4, (OUT_DIM,), dtype, -bound2, bound2)
    return w1, b1, w2, b2


if __name__ == "__main__":
    input_dim = 64
    hidden_dim = 32
    batch = 8

    key = jax.random.PRNGKey(0)
    kx, kp = jax.random.split(key)
    x = jax.random.normal(kx, (batch, input_dim), jnp.float32)
    w1, b1, w2, b2 = init_params(kp, input_dim, hidden_dim)

    out = feedforward(x, w1, b1, w2, b2)
    out = jax.block_until_ready(out)

    # Reference check in plain JAX (same math as the PyTorch module).
    ref = jnp.maximum(x @ w1 + b1, 0.0) @ w2 + b2
    assert out.shape == (batch, OUT_DIM)
    assert jnp.allclose(out, ref, atol=1e-5, rtol=1e-5)

    print("KERNEL_OK")
</pallas_src>

<mosaic_0001>
module attributes {stable_mosaic.version = 11 : i64} {
  func.func @_mlp_kernel(%arg0: i32, %arg1: memref<8x64xf32, #tpu.memory_space<vmem>>, %arg2: memref<64x128xf32, #tpu.memory_space<vmem>>, %arg3: memref<1x128xf32, #tpu.memory_space<vmem>>, %arg4: memref<128x36xf32, #tpu.memory_space<vmem>>, %arg5: memref<1x36xf32, #tpu.memory_space<vmem>>, %arg6: memref<8x36xf32, #tpu.memory_space<vmem>>) attributes {dimension_semantics = [#tpu.dimension_semantics<parallel>], iteration_bounds = array<i64: 1>, scalar_prefetch = 0 : i64, scratch_operands = 0 : i64, tpu.core_type = #tpu.core_type<tc>, window_params = [{transform_indices = @transform_0, window_bounds = array<i64: 8, 64>}, {pipeline_mode = #tpu.pipeline_mode<synchronous>, transform_indices = @transform_1, window_bounds = array<i64: 64, 128>}, {pipeline_mode = #tpu.pipeline_mode<synchronous>, transform_indices = @transform_2, window_bounds = array<i64: 1, 128>}, {pipeline_mode = #tpu.pipeline_mode<synchronous>, transform_indices = @transform_3, window_bounds = array<i64: 128, 36>}, {pipeline_mode = #tpu.pipeline_mode<synchronous>, transform_indices = @transform_4, window_bounds = array<i64: 1, 36>}, {transform_indices = @transform_5, window_bounds = array<i64: 8, 36>}]} {
    %c0 = arith.constant 0 : index
    %c0_0 = arith.constant 0 : index
    %0 = vector.load %arg1[%c0, %c0_0] : memref<8x64xf32, #tpu.memory_space<vmem>>, vector<8x64xf32>
    %c0_1 = arith.constant 0 : index
    %c0_2 = arith.constant 0 : index
    %1 = vector.load %arg2[%c0_1, %c0_2] : memref<64x128xf32, #tpu.memory_space<vmem>>, vector<64x128xf32>
    %cst = arith.constant dense<0.000000e+00> : vector<8x128xf32>
    %2 = tpu.matmul %0, %1, %cst {dimension_numbers = #tpu.dot_dimension_numbers<[1], [0], [0], [1], [0, 0, 1, 1], [], []>} : vector<8x64xf32>, vector<64x128xf32>, vector<8x128xf32> -> vector<8x128xf32>
    %c0_3 = arith.constant 0 : index
    %c0_4 = arith.constant 0 : index
    %3 = vector.load %arg3[%c0_3, %c0_4] : memref<1x128xf32, #tpu.memory_space<vmem>>, vector<1x128xf32>
    %4 = vector.broadcast %3 : vector<1x128xf32> to vector<8x128xf32>
    %5 = arith.addf %2, %4 : vector<8x128xf32>
    %cst_5 = arith.constant 0.000000e+00 : f32
    %6 = vector.broadcast %cst_5 : f32 to vector<8x128xf32>
    %7 = arith.maximumf %5, %6 : vector<8x128xf32>
    %c0_6 = arith.constant 0 : index
    %c0_7 = arith.constant 0 : index
    %8 = vector.load %arg4[%c0_6, %c0_7] : memref<128x36xf32, #tpu.memory_space<vmem>>, vector<128x36xf32>
    %cst_8 = arith.constant dense<0.000000e+00> : vector<8x36xf32>
    %9 = tpu.matmul %7, %8, %cst_8 {dimension_numbers = #tpu.dot_dimension_numbers<[1], [0], [0], [1], [0, 0, 1, 1], [], []>} : vector<8x128xf32>, vector<128x36xf32>, vector<8x36xf32> -> vector<8x36xf32>
    %c0_9 = arith.constant 0 : index
    %c0_10 = arith.constant 0 : index
    %10 = vector.load %arg5[%c0_9, %c0_10] : memref<1x36xf32, #tpu.memory_space<vmem>>, vector<1x36xf32>
    %11 = vector.broadcast %10 : vector<1x36xf32> to vector<8x36xf32>
    %12 = arith.addf %9, %11 : vector<8x36xf32>
    %c0_11 = arith.constant 0 : index
    %c0_12 = arith.constant 0 : index
    %13 = vector.load %arg6[%c0_11, %c0_12] : memref<8x36xf32, #tpu.memory_space<vmem>>, vector<8x36xf32>
    tpu.vector_store %arg6[%c0_11, %c0_12], %12 {strides = array<i32>} : memref<8x36xf32, #tpu.memory_space<vmem>>, vector<8x36xf32>,
    return
  }
  func.func @transform_0(%arg0: i32) -> (i32, i32) {
    %c0_i32 = arith.constant 0 : i32
    %c0_i32_0 = arith.constant 0 : i32
    return %arg0, %c0_i32 : i32, i32
  }
  func.func @transform_1(%arg0: i32) -> (i32, i32) {
    %c0_i32 = arith.constant 0 : i32
    %c0_i32_0 = arith.constant 0 : i32
    %c0_i32_1 = arith.constant 0 : i32
    return %c0_i32, %c0_i32_0 : i32, i32
  }
  func.func @transform_2(%arg0: i32) -> (i32, i32) {
    %c0_i32 = arith.constant 0 : i32
    %c0_i32_0 = arith.constant 0 : i32
    %c0_i32_1 = arith.constant 0 : i32
    return %c0_i32, %c0_i32_0 : i32, i32
  }
  func.func @transform_3(%arg0: i32) -> (i32, i32) {
    %c0_i32 = arith.constant 0 : i32
    %c0_i32_0 = arith.constant 0 : i32
    %c0_i32_1 = arith.constant 0 : i32
    return %c0_i32, %c0_i32_0 : i32, i32
  }
  func.func @transform_4(%arg0: i32) -> (i32, i32) {
    %c0_i32 = arith.constant 0 : i32
    %c0_i32_0 = arith.constant 0 : i32
    %c0_i32_1 = arith.constant 0 : i32
    return %c0_i32, %c0_i32_0 : i32, i32
  }
  func.func @transform_5(%arg0: i32) -> (i32, i32) {
    %c0_i32 = arith.constant 0 : i32
    %c0_i32_0 = arith.constant 0 : i32
    return %arg0, %c0_i32 : i32, i32
  }
}

</mosaic_0001>

<bundles_post_ra>
// kernel: tpu_custom_call.1
= control target key start
LH: loop header
LB: loop body
LE: loop exit
PB: predicated region body
PF: predicated region fallthrough
CT: control target
= control target key end

     0   :  { %v368_v3 = vmov 0.0|0.0   ;;  %vm369_vm0 = vmmov 0   ;;  %v370_v6 = vmov 0.0   ;;  %s495_s0 = inlined_call_operand.vmem [shape: f32[8,64], index: 0, kind: input, shape index: {}]   ;;  %s496_s1 = inlined_call_operand.vmem [shape: f32[64,128], index: 1, kind: input, shape index: {}]   ;;  %s497_s2 = inlined_call_operand.vmem [shape: f32[1,128], index: 2, kind: input, shape index: {}]   ;;  %s498_s3 = inlined_call_operand.vmem [shape: f32[128,36], index: 3, kind: input, shape index: {}]   ;;  %s499_s4 = inlined_call_operand.vmem [shape: f32[1,36], index: 4, kind: input, shape index: {}]   ;;  %s500_s5 = inlined_call_operand.hbm [shape: f32[8,36], index: 5, kind: output, shape index: {}]  }
   0x1   :  { %v22_v0 = vld [vmem:[%s496_s1] sm:$0xff]  ;;  %v23_v1 = vld [vmem:[%s496_s1 + $0x8] sm:$0xff]  ;;  %v24_v2 = vld [vmem:[%s496_s1 + $0x10] sm:$0xff]  ;;  %304 = vmatprep.subr.bf16.mxu0 %v368_v3  ;;  %266 = vmatprep.mubr.msk.f32.mxu0 %vm369_vm0, %v370_v6 }
   0x2   :  { %v305_v4 = vpack.c.bf16 %v23_v1, %v22_v0  ;;  %v25_v5 = vld [vmem:[%s496_s1 + $0x18] sm:$0xff]  ;;  %316 = vmatprep.subr.bf16.mxu1 %v368_v3  ;;  %301 = vmatprep.mubr.msk.f32.mxu1 %vm369_vm0, %v370_v6  ;;  %v112_v8 = vld [vmem:[%s498_s3] sm:$0xff]  ;;  %v113_v9 = vld [vmem:[%s498_s3 + $0x8] sm:$0xff] }
   0x3   :  { %v308_v7 = vpack.c.bf16 %v25_v5, %v24_v2  ;;  %v114_v10 = vld [vmem:[%s498_s3 + $0x10] sm:$0xff]  ;;  %v26_v11 = vld [vmem:[%s496_s1 + $0x20] sm:$0xff]  ;;  %v27_v12 = vld [vmem:[%s496_s1 + $0x28] sm:$0xff]  ;;  %v317_v13 = vpack.c.bf16 %v113_v9, %v112_v8 }
   0x4   :  { %306 = vmatpush3.bf16.msra.mxu0 %v305_v4  ;;  %v115_v14 = vld [vmem:[%s498_s3 + $0x18] sm:$0xff]  ;;  %v311_v16 = vpack.c.bf16 %v27_v12, %v26_v11  ;;  %v116_v17 = vld [vmem:[%s498_s3 + $0x20] sm:$0xff]  ;;  %v117_v18 = vld [vmem:[%s498_s3 + $0x28] sm:$0xff] }
   0x5   :  { %307 = vmatprep.subr.bf16.mxu0 %v368_v3  ;;  %318 = vmatpush3.bf16.msra.mxu1 %v317_v13  ;;  %v320_v15 = vpack.c.bf16 %v115_v14, %v114_v10  ;;  %v28_v19 = vld [vmem:[%s496_s1 + $0x30] sm:$0xff]  ;;  %v29_v20 = vld [vmem:[%s496_s1 + $0x38] sm:$0xff] }
   0x6   :  { %319 = vmatprep.subr.bf16.mxu1 %v368_v3 }
   0x8   :  { %309 = vmatpush3.bf16.msra.mxu0 %v308_v7 }
   0x9   :  { %310 = vmatprep.subr.bf16.mxu0 %v368_v3 }
   0xa   :  { %10 = vsyncpa [#allocation3], 0  ;;  %321 = vmatpush3.bf16.msra.mxu1 %v320_v15  ;;  %v323_v21 = vpack.c.bf16 %v117_v18, %v116_v17  ;;  %v314_v22 = vpack.c.bf16 %v29_v20, %v28_v19  ;;  %v118_v23 = vld [vmem:[%s498_s3 + $0x30] sm:$0xff]  ;;  %v119_v24 = vld [vmem:[%s498_s3 + $0x38] sm:$0xff]  ;;  %vm37_vm1 = vcmask 523264   ;;  %s371_s20 = smov [#allocation2]  }
   0xb   :  { %322 = vmatprep.subr.bf16.mxu1 %v368_v3  ;;  %v326_v25 = vpack.c.bf16 %v119_v24, %v118_v23  ;;  %v21_v26 = vld [vmem:[%s495_s0] sm:$0xff]  ;;  %v121_v28 = vld [vmem:[%s498_s3 + $0x48] sm:$0xff]  ;;  %v122_v30 = vld [vmem:[%s498_s3 + $0x50] sm:$0xff]  ;;  %s213_s21 = sshll.u32 %s371_s20, 4  ;;  %vm205_vm2 = vcmask 293888   ;;  %s214_s21 = int_to_ptr.vmem [resolvable:$true] %s213_s21 }
   0xc   :  { %312 = vmatpush3.bf16.msra.mxu0 %v311_v16  ;;  %v120_v27 = vld [vmem:[%s498_s3 + $0x40] sm:$0xff]  ;;  %v123_v31 = vld [vmem:[%s498_s3 + $0x58] sm:$0xff]  ;;  %v125_v34 = vld [vmem:[%s498_s3 + $0x68] sm:$0xff]  ;;  %p349_p1 = scmp.lt.s32.totalorder %s214_s21, %s214_s21 }
   0xd   :  { %313 = vmatprep.subr.bf16.mxu0 %v368_v3  ;;  %v329_v29 = vpack.c.bf16 %v121_v28, %v120_v27  ;;  %v332_v32 = vpack.c.bf16 %v123_v31, %v122_v30  ;;  %v124_v33 = vld [vmem:[%s498_s3 + $0x60] sm:$0xff]  ;;  %v126_v36 = vld [vmem:[%s498_s3 + $0x70] sm:$0xff]  ;;  %v127_v37 = vld [vmem:[%s498_s3 + $0x78] sm:$0xff]  ;;  %s344_s3 = scalar_lea.vmem %s214_s21, 128 }
   0xe   :  { %324 = vmatpush3.bf16.msra.mxu1 %v323_v21  ;;  %v335_v35 = vpack.c.bf16 %v125_v34, %v124_v33  ;;  %v338_v38 = vpack.c.bf16 %v127_v37, %v126_v36  ;;  %v221_v39 = vld [vmem:[%s497_s2] ss:$0 sm:$0xff]  ;;  %p345_p0 = scmp.ne.s32.totalorder %s214_s21, %s344_s3  ;;  %p350_p2 = scmp.lt.s32.totalorder %s344_s3, %s344_s3 }
   0xf   :  { %325 = vmatprep.subr.bf16.mxu1 %v368_v3  ;;  %v223_v44 = vld [vmem:[%s499_s4] ss:$0 sm:$0xff] }
  0x10   :  { %315 = vmatpush3.bf16.msra.mxu0 %v314_v22  ;;  %p351_p3 = por %p350_p2, %p349_p1 }
  0x12   :  { %327 = vmatpush3.bf16.msra.mxu1 %v326_v25  ;;  %p352_p4 = pnand %p351_p3, %p345_p0 }
  0x13   :  { %267 = vmatmul.mubr.msk.f32.vlgmr.msra.gmra.mrb[0].mxu0 %vm37_vm1, %v21_v26  ;;  %328 = vmatprep.subr.bf16.mxu1 %v368_v3 }
  0x16   :  { %330 = vmatpush3.bf16.msra.mxu1 %v329_v29 }
  0x17   :  { %331 = vmatprep.subr.bf16.mxu1 %v368_v3 }
  0x1a   :  { %333 = vmatpush3.bf16.msra.mxu1 %v332_v32 }
  0x1b   :  { %334 = vmatprep.subr.bf16.mxu1 %v368_v3 }
  0x1e   :  { %336 = vmatpush3.bf16.msra.mxu1 %v335_v35 }
  0x1f   :  { %337 = vmatprep.subr.bf16.mxu1 %v368_v3 }
  0x22   :  { %339 = vmatpush3.bf16.msra.mxu1 %v338_v38 }
  0xe6   :  { %v107_v40 = vpop.f32.mrb[0].mxu0 }
  0xe7   :  { %v108_v41 = vadd.f32 %v221_v39, %v107_v40  ;;  %v268_v42 = vpop.f32.mrb[1].mxu0 }
  0xe9   :  { %v111_v43 = vmax.f32 %v108_v41, 0.0 }
  0xeb   :  { %302 = vmatmul.mubr.f32.vlgmr.msra.gmra.mrb[0].mxu1 %v111_v43 }
 0x1be   :  { %v201_v45 = vpop.f32.mrb[0].mxu1 }
 0x1bf   :  { %v202_v46 = vadd.f32 %v223_v44, %v201_v45  ;;  %v303_v47 = vpop.f32.mrb[1].mxu1 }
 0x1c1   :  { %206 = vst.msk [vmem:[#allocation2] sm:$0xff] %vm205_vm2, %v202_v46 }
 0x1c2   :  { %355 = shalt.err (!%p352_p4)
}
 0x1c3   :  { %s356_s23 = scalar_lea.hbm %s500_s5, 128 }
 0x1c4   :  { %p357_p5 = scmp.ne.s32.totalorder %s500_s5, %s356_s23  ;;  %p360_p6 = scmp.lt.u32.totalorder %s356_s23, %s500_s5 }
 0x1c6   :  { %p362_p7 = pnand %p360_p6, %p357_p5 }
 0x1c8   :  { %365 = shalt.err (!%p362_p7)
}
 0x1c9   :  { %216 = dma.vmem_to_hbm [thread:$0]  %s214_s21, 128, %s500_s5, [#allocation3]  }
 0x1ca   :  { %366 = dma.done.wait [#allocation3], 128  }
 0x1cb   :  { %367 = vsyncadd [#allocation3], 4294967168 }
 0x1cc   :  { %220 = vsyncpa [#allocation3], 1 }

</bundles_post_ra>
